<compile_context>
chip_gen: v7x
topology: tpu7x:2x2x1
jax: 0.10.0
libtpu: 0.0.40
codegen_flags: <defaults>
</compile_context>

<pallas_src>
import math
import jax
import jax.numpy as jnp
from jax.experimental import pallas as pl
from jax.experimental.pallas import tpu as pltpu

# ----------------------------- problem sizes ------------------------------
B, S, T = 2, 8, 8          # batch, source len, target len
H, E, V = 32, 32, 128      # hidden, embed dim, vocab size
_INV_SQRT_H = 1.0 / math.sqrt(H)


# ------------------------------ Pallas kernel ------------------------------
def decoder_score_kernel(mem_ref, emb_ref, ids_ref,
                         wq_ref, wc1_ref, wc2_ref, wv_ref,
                         out_ref):
    # One grid step == one batch example.
    mem = mem_ref[0]                       # (S, H)  bf16
    emb = emb_ref[0]                       # (T, E)  bf16
    ids = ids_ref[0]                       # (T, 1)  int32

    # --- query projection: single 2-D bf16 MXU matmul, f32 accumulate ---
    q = jnp.dot(emb, wq_ref[...], preferred_element_type=jnp.float32)    # (T, H) f32
    q_bf = q.astype(jnp.bfloat16)

    # --- scaled dot-product attention over encoder memories ---
    # 2-D dot per example (contract the hidden dim of both operands) instead of a
    # batched einsum -> one clean MXU push.
    att = jax.lax.dot_general(q_bf, mem, (((1,), (1,)), ((), ())),
                              preferred_element_type=jnp.float32) * _INV_SQRT_H   # (T, S)
    att = att - jnp.max(att, axis=-1, keepdims=True)
    e = jnp.exp(att)
    # approx reciprocal -> EUP slot (otherwise idle here), frees VALU cycles.
    p = e * pl.reciprocal(jnp.sum(e, axis=-1, keepdims=True), approx=True)
    ctx = jnp.dot(p.astype(jnp.bfloat16), mem,
                  preferred_element_type=jnp.float32)                    # (T, H) f32

    # --- tanh readout:  tanh([q ; ctx] @ Wc)  ==  tanh(q@Wc1 + ctx@Wc2) ---
    comb = jnp.tanh(
        jnp.dot(q_bf, wc1_ref[...], preferred_element_type=jnp.float32) +
        jnp.dot(ctx.astype(jnp.bfloat16), wc2_ref[...],
                preferred_element_type=jnp.float32))                     # (T, H) f32

    # --- vocab projection ---
    logits = jnp.dot(comb.astype(jnp.bfloat16), wv_ref[...],
                     preferred_element_type=jnp.float32)                 # (T, V) f32

    # --- fused gold-token gather + log-partition (no full log-prob tensor) ---
    vocab_iota = jax.lax.broadcasted_iota(jnp.int32, (T, V), 1)
    onehot = (vocab_iota == ids).astype(jnp.float32)                     # (T, V)
    tok_logit = jnp.sum(logits * onehot, axis=-1, keepdims=True)         # (T, 1)
    m = jnp.max(logits, axis=-1, keepdims=True)
    logz = jnp.log(jnp.sum(jnp.exp(logits - m), axis=-1, keepdims=True)) + m
    tok_lp = tok_logit - logz                                            # (T, 1)
    # TODO(synk): no source-length / target-padding mask (fixed toy shapes here).

    out_ref[0] = jnp.sum(tok_lp, axis=0, keepdims=True)                  # (1, 1)


def decoder_score(memories, tgt_emb, tgt_ids, wq, wc1, wc2, wv):
    # bf16 operands for every MXU matmul (half the DMA bytes, 2x MXU throughput).
    mem_bf = memories.astype(jnp.bfloat16)
    emb_bf = tgt_emb.astype(jnp.bfloat16)
    wq_bf, wc1_bf, wc2_bf, wv_bf = (w.astype(jnp.bfloat16)
                                    for w in (wq, wc1, wc2, wv))
    ids3 = tgt_ids.astype(jnp.int32)[:, :, None]          # (B, T, 1)

    out3 = pl.pallas_call(
        decoder_score_kernel,
        out_shape=jax.ShapeDtypeStruct((B, 1, 1), jnp.float32),
        grid=(B,),
        in_specs=[
            pl.BlockSpec((1, S, H), lambda b: (b, 0, 0)),   # memories (per example)
            pl.BlockSpec((1, T, E), lambda b: (b, 0, 0)),   # target embeddings
            pl.BlockSpec((1, T, 1), lambda b: (b, 0, 0)),   # gold token ids
            pl.BlockSpec((E, H), lambda b: (0, 0)),         # Wq   (resident across steps)
            pl.BlockSpec((H, H), lambda b: (0, 0)),         # Wc1
            pl.BlockSpec((H, H), lambda b: (0, 0)),         # Wc2
            pl.BlockSpec((H, V), lambda b: (0, 0)),         # Wv
        ],
        out_specs=pl.BlockSpec((1, 1, 1), lambda b: (b, 0, 0)),
        compiler_params=pltpu.CompilerParams(
            dimension_semantics=("parallel",)),             # megacore sharding on v7x
    )(mem_bf, emb_bf, ids3, wq_bf, wc1_bf, wc2_bf, wv_bf)
    return out3.reshape(B, 1)


# --------------------------- pure-JAX reference ----------------------------
def decoder_score_ref(memories, tgt_emb, tgt_ids, wq, wc1, wc2, wv):
    # Mirrors the kernel's bf16-MXU / f32-softmax numerics.
    mem_bf = memories.astype(jnp.bfloat16)
    emb_bf = tgt_emb.astype(jnp.bfloat16)
    wq_bf, wc1_bf, wc2_bf, wv_bf = (w.astype(jnp.bfloat16)
                                    for w in (wq, wc1, wc2, wv))
    q = jnp.einsum('bte,eh->bth', emb_bf, wq_bf,
                   preferred_element_type=jnp.float32)
    q_bf = q.astype(jnp.bfloat16)
    att = jnp.einsum('bth,bsh->bts', q_bf, mem_bf,
                     preferred_element_type=jnp.float32) * _INV_SQRT_H
    p = jax.nn.softmax(att, axis=-1)
    ctx = jnp.einsum('bts,bsh->bth', p.astype(jnp.bfloat16), mem_bf,
                     preferred_element_type=jnp.float32)
    comb = jnp.tanh(
        jnp.einsum('bth,hk->btk', q_bf, wc1_bf,
                   preferred_element_type=jnp.float32) +
        jnp.einsum('bth,hk->btk', ctx.astype(jnp.bfloat16), wc2_bf,
                   preferred_element_type=jnp.float32))
    logits = jnp.einsum('btk,kv->btv', comb.astype(jnp.bfloat16), wv_bf,
                        preferred_element_type=jnp.float32)
    logp = jax.nn.log_softmax(logits, axis=-1)
    tok_lp = jnp.take_along_axis(logp, tgt_ids[:, :, None], axis=-1)[..., 0]
    return jnp.sum(tok_lp, axis=-1, keepdims=True)


# --------------------------------- driver ----------------------------------
if __name__ == "__main__":
    key = jax.random.PRNGKey(0)
    k_mem, k_emb, k_ids, k_wq, k_wc1, k_wc2, k_wv = jax.random.split(key, 7)

    memories = jax.random.normal(k_mem, (B, S, H), dtype=jnp.float32)
    tgt_emb = jax.random.normal(k_emb, (B, T, E), dtype=jnp.float32)
    tgt_ids = jax.random.randint(k_ids, (B, T), 0, V, dtype=jnp.int32)

    # deterministic parameter init (fan-in scaled normals)
    wq = jax.random.normal(k_wq, (E, H), dtype=jnp.float32) / math.sqrt(E)
    wc1 = jax.random.normal(k_wc1, (H, H), dtype=jnp.float32) / math.sqrt(H)
    wc2 = jax.random.normal(k_wc2, (H, H), dtype=jnp.float32) / math.sqrt(H)
    wv = jax.random.normal(k_wv, (H, V), dtype=jnp.float32) / math.sqrt(H)

    out = decoder_score(memories, tgt_emb, tgt_ids, wq, wc1, wc2, wv)
    out = jax.block_until_ready(out)

    ref = decoder_score_ref(memories, tgt_emb, tgt_ids, wq, wc1, wc2, wv)
    assert out.shape == (B, 1)
    # Loose-but-meaningful tolerance: bf16 MXU operands + approx EUP reciprocal in the
    # attention softmax vs. exact division in the reference (score magnitude ~ -40).
    assert jnp.allclose(out, ref, atol=1e-1, rtol=1e-2), (out, ref)

    print("KERNEL_OK")
</pallas_src>

<mosaic_0001>
module attributes {stable_mosaic.version = 11 : i64} {
  func.func @decoder_score_kernel(%arg0: i32, %arg1: memref<1x8x32xbf16, #tpu.memory_space<vmem>>, %arg2: memref<1x8x32xbf16, #tpu.memory_space<vmem>>, %arg3: memref<1x8x1xi32, #tpu.memory_space<vmem>>, %arg4: memref<32x32xbf16, #tpu.memory_space<vmem>>, %arg5: memref<32x32xbf16, #tpu.memory_space<vmem>>, %arg6: memref<32x32xbf16, #tpu.memory_space<vmem>>, %arg7: memref<32x128xbf16, #tpu.memory_space<vmem>>, %arg8: memref<1x1x1xf32, #tpu.memory_space<vmem>>) attributes {dimension_semantics = [#tpu.dimension_semantics<parallel>], iteration_bounds = array<i64: 2>, scalar_prefetch = 0 : i64, scratch_operands = 0 : i64, tpu.core_type = #tpu.core_type<tc>, window_params = [{transform_indices = @transform_0, window_bounds = array<i64: 1, 8, 32>}, {transform_indices = @transform_1, window_bounds = array<i64: 1, 8, 32>}, {transform_indices = @transform_2, window_bounds = array<i64: 1, 8, 1>}, {pipeline_mode = #tpu.pipeline_mode<synchronous>, transform_indices = @transform_3, window_bounds = array<i64: 32, 32>}, {pipeline_mode = #tpu.pipeline_mode<synchronous>, transform_indices = @transform_4, window_bounds = array<i64: 32, 32>}, {pipeline_mode = #tpu.pipeline_mode<synchronous>, transform_indices = @transform_5, window_bounds = array<i64: 32, 32>}, {pipeline_mode = #tpu.pipeline_mode<synchronous>, transform_indices = @transform_6, window_bounds = array<i64: 32, 128>}, {transform_indices = @transform_7, window_bounds = array<i64: 1, 1, 1>}]} {
    %c0 = arith.constant 0 : index
    %c0_0 = arith.constant 0 : index
    %c0_1 = arith.constant 0 : index
    %0 = vector.load %arg1[%c0, %c0_0, %c0_1] : memref<1x8x32xbf16, #tpu.memory_space<vmem>>, vector<1x8x32xbf16>
    %1 = vector.shape_cast %0 : vector<1x8x32xbf16> to vector<8x32xbf16>
    %c0_2 = arith.constant 0 : index
    %c0_3 = arith.constant 0 : index
    %c0_4 = arith.constant 0 : index
    %2 = vector.load %arg2[%c0_2, %c0_3, %c0_4] : memref<1x8x32xbf16, #tpu.memory_space<vmem>>, vector<1x8x32xbf16>
    %3 = vector.shape_cast %2 : vector<1x8x32xbf16> to vector<8x32xbf16>
    %c0_5 = arith.constant 0 : index
    %c0_6 = arith.constant 0 : index
    %c0_7 = arith.constant 0 : index
    %4 = vector.load %arg3[%c0_5, %c0_6, %c0_7] : memref<1x8x1xi32, #tpu.memory_space<vmem>>, vector<1x8x1xi32>
    %5 = vector.shape_cast %4 : vector<1x8x1xi32> to vector<8x1xi32>
    %c0_8 = arith.constant 0 : index
    %c0_9 = arith.constant 0 : index
    %6 = vector.load %arg4[%c0_8, %c0_9] : memref<32x32xbf16, #tpu.memory_space<vmem>>, vector<32x32xbf16>
    %cst = arith.constant dense<0.000000e+00> : vector<8x32xf32>
    %7 = tpu.matmul %3, %6, %cst {dimension_numbers = #tpu.dot_dimension_numbers<[1], [0], [0], [1], [0, 0, 1, 1], [], []>} : vector<8x32xbf16>, vector<32x32xbf16>, vector<8x32xf32> -> vector<8x32xf32>
    %8 = arith.truncf %7 : vector<8x32xf32> to vector<8x32xbf16>
    %cst_10 = arith.constant dense<0.000000e+00> : vector<8x8xf32>
    %9 = tpu.matmul %8, %1, %cst_10 {dimension_numbers = #tpu.dot_dimension_numbers<[1], [1], [0], [0], [0, 0, 1, 0], [], []>} : vector<8x32xbf16>, vector<8x32xbf16>, vector<8x8xf32> -> vector<8x8xf32>
    %cst_11 = arith.constant 0.176776692 : f32
    %10 = vector.broadcast %cst_11 : f32 to vector<8x8xf32>
    %11 = arith.mulf %9, %10 : vector<8x8xf32>
    %cst_12 = arith.constant dense<0xFF800000> : vector<8xf32>
    %12 = vector.multi_reduction <maximumf>, %11, %cst_12 [1] : vector<8x8xf32> to vector<8xf32>
    %13 = vector.shape_cast %12 : vector<8xf32> to vector<8x1xf32>
    %14 = vector.broadcast %13 : vector<8x1xf32> to vector<8x8xf32>
    %15 = arith.subf %11, %14 : vector<8x8xf32>
    %16 = math.exp %15 : vector<8x8xf32>
    %cst_13 = arith.constant dense<0.000000e+00> : vector<8xf32>
    %17 = vector.multi_reduction <add>, %16, %cst_13 [1] : vector<8x8xf32> to vector<8xf32>
    %18 = vector.shape_cast %17 : vector<8xf32> to vector<8x1xf32>
    %19 = tpu.reciprocal %18 {approx = true} : vector<8x1xf32> -> vector<8x1xf32>
    %20 = vector.broadcast %19 : vector<8x1xf32> to vector<8x8xf32>
    %21 = arith.mulf %16, %20 : vector<8x8xf32>
    %22 = arith.truncf %21 : vector<8x8xf32> to vector<8x8xbf16>
    %cst_14 = arith.constant dense<0.000000e+00> : vector<8x32xf32>
    %23 = tpu.matmul %22, %1, %cst_14 {dimension_numbers = #tpu.dot_dimension_numbers<[1], [0], [0], [1], [0, 0, 1, 1], [], []>} : vector<8x8xbf16>, vector<8x32xbf16>, vector<8x32xf32> -> vector<8x32xf32>
    %c0_15 = arith.constant 0 : index
    %c0_16 = arith.constant 0 : index
    %24 = vector.load %arg5[%c0_15, %c0_16] : memref<32x32xbf16, #tpu.memory_space<vmem>>, vector<32x32xbf16>
    %cst_17 = arith.constant dense<0.000000e+00> : vector<8x32xf32>
    %25 = tpu.matmul %8, %24, %cst_17 {dimension_numbers = #tpu.dot_dimension_numbers<[1], [0], [0], [1], [0, 0, 1, 1], [], []>} : vector<8x32xbf16>, vector<32x32xbf16>, vector<8x32xf32> -> vector<8x32xf32>
    %26 = arith.truncf %23 : vector<8x32xf32> to vector<8x32xbf16>
    %c0_18 = arith.constant 0 : index
    %c0_19 = arith.constant 0 : index
    %27 = vector.load %arg6[%c0_18, %c0_19] : memref<32x32xbf16, #tpu.memory_space<vmem>>, vector<32x32xbf16>
    %cst_20 = arith.constant dense<0.000000e+00> : vector<8x32xf32>
    %28 = tpu.matmul %26, %27, %cst_20 {dimension_numbers = #tpu.dot_dimension_numbers<[1], [0], [0], [1], [0, 0, 1, 1], [], []>} : vector<8x32xbf16>, vector<32x32xbf16>, vector<8x32xf32> -> vector<8x32xf32>
    %29 = arith.addf %25, %28 : vector<8x32xf32>
    %30 = math.tanh %29 : vector<8x32xf32>
    %31 = arith.truncf %30 : vector<8x32xf32> to vector<8x32xbf16>
    %c0_21 = arith.constant 0 : index
    %c0_22 = arith.constant 0 : index
    %32 = vector.load %arg7[%c0_21, %c0_22] : memref<32x128xbf16, #tpu.memory_space<vmem>>, vector<32x128xbf16>
    %cst_23 = arith.constant dense<0.000000e+00> : vector<8x128xf32>
    %33 = tpu.matmul %31, %32, %cst_23 {dimension_numbers = #tpu.dot_dimension_numbers<[1], [0], [0], [1], [0, 0, 1, 1], [], []>} : vector<8x32xbf16>, vector<32x128xbf16>, vector<8x128xf32> -> vector<8x128xf32>
    %34 = tpu.iota {dimensions = array<i32: 1>} : vector<8x128xi32>
    %35 = vector.broadcast %5 : vector<8x1xi32> to vector<8x128xi32>
    %36 = arith.cmpi eq, %34, %35 : vector<8x128xi32>
    %37 = arith.extui %36 : vector<8x128xi1> to vector<8x128xi32>
    %38 = arith.sitofp %37 : vector<8x128xi32> to vector<8x128xf32>
    %39 = arith.mulf %33, %38 : vector<8x128xf32>
    %cst_24 = arith.constant dense<0.000000e+00> : vector<8xf32>
    %40 = vector.multi_reduction <add>, %39, %cst_24 [1] : vector<8x128xf32> to vector<8xf32>
    %41 = vector.shape_cast %40 : vector<8xf32> to vector<8x1xf32>
    %cst_25 = arith.constant dense<0xFF800000> : vector<8xf32>
    %42 = vector.multi_reduction <maximumf>, %33, %cst_25 [1] : vector<8x128xf32> to vector<8xf32>
    %43 = vector.shape_cast %42 : vector<8xf32> to vector<8x1xf32>
    %44 = vector.broadcast %43 : vector<8x1xf32> to vector<8x128xf32>
    %45 = arith.subf %33, %44 : vector<8x128xf32>
    %46 = math.exp %45 : vector<8x128xf32>
    %cst_26 = arith.constant dense<0.000000e+00> : vector<8xf32>
    %47 = vector.multi_reduction <add>, %46, %cst_26 [1] : vector<8x128xf32> to vector<8xf32>
    %48 = vector.shape_cast %47 : vector<8xf32> to vector<8x1xf32>
    %49 = math.log %48 : vector<8x1xf32>
    %50 = arith.addf %49, %43 : vector<8x1xf32>
    %51 = arith.subf %41, %50 : vector<8x1xf32>
    %cst_27 = arith.constant dense<0.000000e+00> : vector<1xf32>
    %52 = vector.multi_reduction <add>, %51, %cst_27 [0] : vector<8x1xf32> to vector<1xf32>
    %53 = vector.shape_cast %52 : vector<1xf32> to vector<1x1xf32>
    %c0_28 = arith.constant 0 : index
    %c0_29 = arith.constant 0 : index
    %c0_30 = arith.constant 0 : index
    %54 = vector.load %arg8[%c0_28, %c0_29, %c0_30] : memref<1x1x1xf32, #tpu.memory_space<vmem>>, vector<1x1x1xf32>
    %55 = vector.shape_cast %54 : vector<1x1x1xf32> to vector<1x1xf32>
    %56 = vector.shape_cast %53 : vector<1x1xf32> to vector<1x1x1xf32>
    tpu.vector_store %arg8[%c0_28, %c0_29, %c0_30], %56 {strides = array<i32>} : memref<1x1x1xf32, #tpu.memory_space<vmem>>, vector<1x1x1xf32>,
    return
  }
  func.func @transform_0(%arg0: i32) -> (i32, i32, i32) {
    %c0_i32 = arith.constant 0 : i32
    %c0_i32_0 = arith.constant 0 : i32
    %c0_i32_1 = arith.constant 0 : i32
    return %arg0, %c0_i32, %c0_i32_0 : i32, i32, i32
  }
  func.func @transform_1(%arg0: i32) -> (i32, i32, i32) {
    %c0_i32 = arith.constant 0 : i32
    %c0_i32_0 = arith.constant 0 : i32
    %c0_i32_1 = arith.constant 0 : i32
    return %arg0, %c0_i32, %c0_i32_0 : i32, i32, i32
  }
  func.func @transform_2(%arg0: i32) -> (i32, i32, i32) {
    %c0_i32 = arith.constant 0 : i32
    %c0_i32_0 = arith.constant 0 : i32
    %c0_i32_1 = arith.constant 0 : i32
    return %arg0, %c0_i32, %c0_i32_0 : i32, i32, i32
  }
  func.func @transform_3(%arg0: i32) -> (i32, i32) {
    %c0_i32 = arith.constant 0 : i32
    %c0_i32_0 = arith.constant 0 : i32
    %c0_i32_1 = arith.constant 0 : i32
    return %c0_i32, %c0_i32_0 : i32, i32
  }
  func.func @transform_4(%arg0: i32) -> (i32, i32) {
    %c0_i32 = arith.constant 0 : i32
    %c0_i32_0 = arith.constant 0 : i32
    %c0_i32_1 = arith.constant 0 : i32
    return %c0_i32, %c0_i32_0 : i32, i32
  }
  func.func @transform_5(%arg0: i32) -> (i32, i32) {
    %c0_i32 = arith.constant 0 : i32
    %c0_i32_0 = arith.constant 0 : i32
    %c0_i32_1 = arith.constant 0 : i32
    return %c0_i32, %c0_i32_0 : i32, i32
  }
  func.func @transform_6(%arg0: i32) -> (i32, i32) {
    %c0_i32 = arith.constant 0 : i32
    %c0_i32_0 = arith.constant 0 : i32
    %c0_i32_1 = arith.constant 0 : i32
    return %c0_i32, %c0_i32_0 : i32, i32
  }
  func.func @transform_7(%arg0: i32) -> (i32, i32, i32) {
    %c0_i32 = arith.constant 0 : i32
    %c0_i32_0 = arith.constant 0 : i32
    %c0_i32_1 = arith.constant 0 : i32
    return %arg0, %c0_i32, %c0_i32_0 : i32, i32, i32
  }
}

</mosaic_0001>

<bundles_post_ra>
// kernel: tpu_custom_call.1
= control target key start
LH: loop header
LB: loop body
LE: loop exit
PB: predicated region body
PF: predicated region fallthrough
CT: control target
= control target key end

     0   :  { %s1526_s0 = inlined_call_operand.hbm [shape: bf16[2,8,32], index: 0, kind: input, shape index: {}]   ;;  %s1527_s1 = inlined_call_operand.hbm [shape: bf16[2,8,32], index: 1, kind: input, shape index: {}]   ;;  %s1528_s2 = inlined_call_operand.vmem [shape: s32[2,8,1], index: 2, kind: input, shape index: {}]   ;;  %s1529_s3 = inlined_call_operand.vmem [shape: bf16[32,32], index: 3, kind: input, shape index: {}]   ;;  %s1530_s4 = inlined_call_operand.vmem [shape: bf16[32,32], index: 4, kind: input, shape index: {}]   ;;  %s1531_s5 = inlined_call_operand.hbm [shape: bf16[32,32], index: 5, kind: input, shape index: {}]   ;;  %s1532_s6 = inlined_call_operand.hbm [shape: bf16[32,128], index: 6, kind: input, shape index: {}]   ;;  %s1533_s7 = inlined_call_operand.vmem [shape: f32[2,1,1], index: 7, kind: output, shape index: {}]  }
   0x1   :  { %1537 = sst [smem:[#allocation13_spill]] %s1531_s5 }
   0x2   :  { %12 = vsyncpa [#allocation3], 0 }
   0x3   :  { %14 = vsyncpa [#allocation3 + $0x1], 0 }
   0x4   :  { %15 = vsyncpa [#allocation5], 0 }
   0x5   :  { %17 = vsyncpa [#allocation5 + $0x1], 0 }
   0x6   :  { %18 = vsyncpa [#allocation8], 0  ;;  %s1265_s24 = smov 0   ;;  %s1267_s25 = smov 0  }
   0x7   :  { %s1269_s26 = smov 0   ;;  %s1271_s27 = smov 0  }
   0x8 LB: > { %s1284_s28 = sadd.s32 4294967295, %s1214_s27   ;;  %p44_p0 = scmp.ne.s32.totalorder %s1206_s25, %s1202_s24  ;;  %s1214_s27 = sphi %s1271_s27, %s1552_s27   ;;  %s1210_s26 = sphi %s1269_s26, %s1551_s26   ;;  %s1206_s25 = sphi %s1267_s25, %s1550_s25   ;;  %s1202_s24 = sphi %s1265_s24, %s1549_s24  }
   0x9   : > { %p1534_p1 = scmp.eq.s32.totalorder %s1284_s28, 0  ;;  %p867_p2 = scmp.ge.s32.totalorder %s1214_s27, 1 }
   0xa   : > { %p217_p3 = scmp.lt.s32.totalorder %s1214_s27, 3  ;;  %s1216_s8 = smov [#allocation6]  }
   0xb   : > { %p1292_p4 = por %p1534_p1, %p44_p0  ;;  %s235_s9 = sshll.u32 %s1216_s8, 4  ;;  %s236_s9 = int_to_ptr.vmem [resolvable:$true] %s235_s9 }
   0xc   : > { %p1296_p5 = pnand %p867_p2, %p217_p3  ;;  %s1217_s11 = smov [#allocation7]  }
   0xd   : > { %s1538_s29 = scalar_select %p1292_p4, 1, 0 }
   0xe   : > { %s1539_s30 = scalar_select %p1296_p5, 1, 0 }
   0xf   : > { %p974_p6 = pneg %p1296_p5  ;;  %s248_s12 = sshll.u32 %s1217_s11, 4  ;;  %s1308_s12 = int_to_ptr.vmem [resolvable:$true] %s248_s12 }
  0x10   : > { %s1541_s5 = sld [smem:[#allocation13_spill]] }
  0x11   : > { %p1304_p7 = pnand %p974_p6, %p1534_p1 }
  0x13   : > { %p1054_p9 = pneg %p1304_p7 }
  0x16   : > { %s1052_s15 = scalar_lea.hbm %s1541_s5, 256 }
  0x17   : > { %p1053_p8 = scmp.ne.s32.totalorder %s1541_s5, %s1052_s15  ;;  %p1059_p12 = scmp.lt.u32.totalorder %s1052_s15, %s1541_s5 }
  0x19   : > { %p1055_p10 = pnand %p1054_p9, %p1053_p8 }
  0x1b   : > { %p1056_p11 = pneg %p1055_p10 }
  0x1d   : > { %p1061_p13 = pnand %p1059_p12, %p1056_p11 }
  0x1f   : > { %1064 = shalt.err (!%p1061_p13)
}
  0x20   : > { %s1065_s20 = scalar_lea.vmem %s236_s9, 256  ;;  %p1073_p6 = scmp.lt.s32.totalorder %s236_s9, %s236_s9 }
  0x21   : > { %p1066_p0 = scmp.ne.s32.totalorder %s236_s9, %s1065_s20  ;;  %p1074_p1 = scmp.lt.s32.totalorder %s1065_s20, %s1065_s20 }
  0x23   : > { %p1068_p2 = pnand %p1066_p0, %p1054_p9  ;;  %p1075_p4 = por %p1074_p1, %p1073_p6 }
  0x25   : > { %p1069_p3 = pneg %p1068_p2 }
  0x27   : > { %p1076_p5 = pnand %p1075_p4, %p1069_p3 }
  0x29   : > { %1079 = shalt.err (!%p1076_p5)
}
  0x2a   : > { %s1218_s21 = smov 64   ;;  %s1219_s22 = smov 4  }
  0x2b   : > { %977 = dma.hbm_to_vmem [thread:$0]  (!%p1304_p7), %s1541_s5, 256, %s236_s9, [#allocation5], %s1218_s21, %s1218_s21, %s1219_s22  }
  0x2c   : > { %s1080_s13 = scalar_lea.hbm %s1532_s6, 256 }
  0x2d   : > { %p1081_p8 = scmp.ne.s32.totalorder %s1532_s6, %s1080_s13  ;;  %p1087_p5 = scmp.lt.u32.totalorder %s1080_s13, %s1532_s6 }
  0x2f   : > { %p1083_p1 = pnand %p1081_p8, %p1054_p9 }
  0x31   : > { %p1084_p4 = pneg %p1083_p1 }
  0x33   : > { %p1089_p10 = pnand %p1087_p5, %p1084_p4 }
  0x35   : > { %1092 = shalt.err (!%p1089_p10)
}
  0x36   : > { %s1093_s9 = scalar_lea.vmem %s1308_s12, 256  ;;  %p1101_p0 = scmp.lt.s32.totalorder %s1308_s12, %s1308_s12 }
  0x37   : > { %p1094_p11 = scmp.ne.s32.totalorder %s1308_s12, %s1093_s9  ;;  %p1102_p2 = scmp.lt.s32.totalorder %s1093_s9, %s1093_s9 }
  0x39   : > { %p1096_p12 = pnand %p1094_p11, %p1054_p9  ;;  %p1103_p3 = por %p1102_p2, %p1101_p0 }
  0x3b   : > { %p1097_p13 = pneg %p1096_p12 }
  0x3d   : > { %p1104_p6 = pnand %p1103_p3, %p1097_p13 }
  0x3f   : > { %1107 = shalt.err (!%p1104_p6)
}
  0x40   : > { %980 = dma.hbm_to_vmem [thread:$0]  (!%p1304_p7), %s1532_s6, 256, %s1308_s12, [#allocation8], %s1218_s21, %s1218_s21, %s1219_s22  }
  0x41   : > { %s1358_s20 = sadd.s32 1, %s1214_s27   ;;  %s31_s23 = sadd.s32 1, %s1210_s26 }
  0x42   : > { %s28_s10 = ssub.s32 %s1214_s27, %s1358_s20  ;;  %p38_p9 = scmp.ne.s32.totalorder %s1210_s26, %s1206_s25 }
  0x43   : > { %p29_p8 = scmp.eq.s32.totalorder %s28_s10, 0  ;;  %p39_p1 = scmp.eq.s32.totalorder %s1214_s27, 0 }
  0x44   : > { %p990_p4 = scmp.lt.s32.totalorder %s1214_s27, 2  ;;  %s262_s24 = sand.u32 1, %s1210_s26  }
  0x45   : > { %s1369_s8 = scalar_select %p29_p8, %s1210_s26, %s31_s23  }
  0x46   : > { %p40_p5 = por %p39_p1, %p38_p9  ;;  %s1371_s11 = sshll.u32 %s262_s24, 2 }
  0x47   : > { %s872_s13 = sshll.u32 %s1214_s27, 6  ;;  %s266_s21 = scalar_lea.vmem [#allocation2], %s1371_s11 }
  0x48   : > { %s1377_s12 = scalar_lea.hbm %s1526_s0, %s872_s13  ;;  %s273_s22 = sshll.u32 %s266_s21, 4  ;;  %s1384_s22 = int_to_ptr.vmem [resolvable:$true] %s273_s22 }
  0x49   : > { %p1380_p7 = pnand %p990_p4, %p40_p5  ;;  %s1389_s18 = scalar_lea.hbm %s1527_s1, %s872_s13 }
  0x4a   : > { %s263_s19 = scalar_lea.sflag [#allocation3], %s262_s24  ;;  %s1108_s23 = scalar_lea.hbm %s1377_s12, 64 }
  0x4b   : > { %p1109_p10 = scmp.ne.s32.totalorder %s1377_s12, %s1108_s23  ;;  %p1110_p11 = pneg %p1380_p7 }
  0x4c   : > { %s1113_s15 = scalar_lea.hbm %s1526_s0, 128  ;;  %p1114_p0 = scmp.lt.u32.totalorder %s1377_s12, %s1526_s0 }
  0x4d   : > { %p1111_p12 = pnand %p1110_p11, %p1109_p10  ;;  %p1115_p2 = scmp.lt.u32.totalorder %s1113_s15, %s1108_s23 }
  0x4e   : > { %p1117_p6 = scmp.lt.u32.totalorder %s1108_s23, %s1377_s12 }
  0x4f   : > { %p1112_p13 = pneg %p1111_p12  ;;  %p1116_p3 = por %p1115_p2, %p1114_p0 }
  0x51   : > { %p1118_p9 = por %p1117_p6, %p1116_p3 }
  0x53   : > { %p1119_p8 = pnand %p1118_p9, %p1112_p13 }
  0x55   : > { %1122 = shalt.err (!%p1119_p8)
}
  0x56   : > { %s1123_s24 = scalar_lea.vmem %s1384_s22, 64  ;;  %s1220_s13 = smov [#allocation2]  }
  0x57   : > { %p1124_p1 = scmp.ne.s32.totalorder %s1384_s22, %s1123_s24  ;;  %s1128_s17 = sshll.u32 %s1220_s13, 4  ;;  %s1129_s17 = int_to_ptr.vmem [resolvable:$false] %s1128_s17 }
  0x58   : > { %s1130_s5 = scalar_lea.vmem %s1129_s17, 128  ;;  %p1131_p10 = scmp.lt.s32.totalorder %s1384_s22, %s1129_s17 }
  0x59   : > { %p1126_p4 = pnand %p1124_p1, %p1110_p11  ;;  %p1132_p12 = scmp.lt.s32.totalorder %s1130_s5, %s1123_s24 }
  0x5b   : > { %p1127_p5 = pneg %p1126_p4  ;;  %p1133_p0 = por %p1132_p12, %p1131_p10 }
  0x5d   : > { %p1134_p2 = pnand %p1133_p0, %p1127_p5 }
  0x5f   : > { %1137 = shalt.err (!%p1134_p2)
}
  0x60   : > { %984 = dma.hbm_to_vmem [thread:$0]  (!%p1380_p7), %s1377_s12, 64, %s1384_s22, %s263_s19  }
  0x61   : > { %s280_s9 = sand.u32 1, %s1214_s27   ;;  %s284_s23 = scalar_lea.vmem [#allocation4], %s1371_s11 }
  0x62   : > { %s291_s10 = sshll.u32 %s284_s23, 4  ;;  %s281_s14 = scalar_lea.sflag [#allocation5], %s280_s9  ;;  %s292_s10 = int_to_ptr.vmem [resolvable:$true] %s291_s10 }
  0x63   : > { %s1138_s15 = scalar_lea.hbm %s1389_s18, 64  ;;  %s1143_s13 = scalar_lea.hbm %s1527_s1, 128 }
  0x64   : > { %p1139_p13 = scmp.ne.s32.totalorder %s1389_s18, %s1138_s15  ;;  %p1144_p9 = scmp.lt.u32.totalorder %s1389_s18, %s1527_s1 }
  0x65   : > { %p1145_p8 = scmp.lt.u32.totalorder %s1143_s13, %s1138_s15  ;;  %p1147_p4 = scmp.lt.u32.totalorder %s1138_s15, %s1389_s18 }
  0x66   : > { %p1141_p3 = pnand %p1139_p13, %p1110_p11 }
  0x67   : > { %p1146_p1 = por %p1145_p8, %p1144_p9 }
  0x68   : > { %p1142_p6 = pneg %p1141_p3 }
  0x69   : > { %p1148_p5 = por %p1147_p4, %p1146_p1 }
  0x6b   : > { %p1149_p10 = pnand %p1148_p5, %p1142_p6 }
  0x6d   : > { %1152 = shalt.err (!%p1149_p10)
}
  0x6e   : > { %s1153_s27 = scalar_lea.vmem %s292_s10, 64  ;;  %s1221_s11 = smov [#allocation4]  }
  0x6f   : > { %p1154_p12 = scmp.ne.s32.totalorder %s292_s10, %s1153_s27  ;;  %s1158_s12 = sshll.u32 %s1221_s11, 4  ;;  %s1159_s12 = int_to_ptr.vmem [resolvable:$false] %s1158_s12 }
  0x70   : > { %s1160_s22 = scalar_lea.vmem %s1159_s12, 128  ;;  %p1161_p13 = scmp.lt.s32.totalorder %s292_s10, %s1159_s12 }
  0x71   : > { %p1156_p0 = pnand %p1154_p12, %p1110_p11  ;;  %p1162_p3 = scmp.lt.s32.totalorder %s1160_s22, %s1153_s27 }
  0x73   : > { %p1157_p2 = pneg %p1156_p0  ;;  %p1163_p8 = por %p1162_p3, %p1161_p13 }
  0x75   : > { %p1164_p9 = pnand %p1163_p8, %p1157_p2 }
  0x77   : > { %1167 = shalt.err (!%p1164_p9)
}
  0x78   : > { %987 = dma.hbm_to_vmem [thread:$0]  (!%p1380_p7), %s1389_s18, 64, %s292_s10, %s281_s14  }
  0x79   : > { %p1543_p6 = scmp.ne.s32.totalorder %s1539_s30, 0 }
  0x7a   : > { %s309_s19 = sand.u32 (!%p1543_p6), 1, %s1206_s25   ;;  %p1544_p11 = scmp.ne.s32.totalorder (!%p1543_p6), %s1538_s29, 0 }
  0x7b   : > { %307 = sbr.rel (%p1543_p6) target bundleno = 1887 (0x75f), region = 48  ;;  %s876_s9 = sshll.u32 (!%p1543_p6), %s309_s19, 2 }
  0x7c   : > { %s310_s23 = scalar_lea.sflag (!%p1543_p6), [#allocation3], %s309_s19  ;;  %s313_s15 = scalar_lea.vmem (!%p1543_p6), [#allocation2], %s876_s9 }
  0x82   : > { %1185 = dma.done.wait (%p1544_p11), %s310_s23, 64  }
  0x83   : > { %1187 = vsyncadd (%p1544_p11), %s310_s23, 4294967232  ;;  %s318_s21 = sand.u32 1, %s1284_s28   ;;  %s322_s24 = scalar_lea.vmem [#allocation4], %s876_s9 }
  0x84   : > { %s319_s16 = scalar_lea.sflag [#allocation5], %s318_s21 }
  0x85   : > { %1189 = dma.done.wait (%p1544_p11), %s319_s16, 64  }
  0x86   : > { %1191 = vsyncadd (%p1544_p11), %s319_s16, 4294967232  ;;  %p1545_p7 = scmp.eq.s32.totalorder %s1284_s28, 0 }
  0x88   : > { %1193 = dma.done.wait (%p1545_p7), [#allocation5], 256   ;;  %p1546_p1 = pmov %p1545_p7 }
  0x8a   : > { %1195 = vsyncadd (%p1546_p1), [#allocation5], 4294967040  ;;  %p1547_p4 = pmov %p1546_p1 }
  0x8b   : > { %p1548_p5 = pmov %p1546_p1 }
  0x8c   : > { %1197 = dma.done.wait (%p1547_p4), [#allocation8], 256  }
  0x8d   : > { %1199 = vsyncadd (%p1548_p5), [#allocation8], 4294967040  ;;  %v1222_v0 = vmov 0.0   ;;  %vm1223_vm0 = vmmov 0   ;;  %v1034_v1 = vld [vmem:[%s1529_s3] sm:$0xff]   ;;  %v1035_v2 = vld [vmem:[%s1529_s3 + $0x8] sm:$0xff]   ;;  %v723_v53 = vlaneseq }
  0x8e   : > { %914 = vmatprep.subr.bf16.mxu0 %v1222_v0  ;;  %918 = vmatprep.mubr.msk.bf16.mxu0 %vm1223_vm0, %v1222_v0  ;;  %vm395_vm1 = vcmask 261120   ;;  %v376_v3 = vld [vmem:[%s313_s15] sm:$0xf]  ;;  %vm503_vm2 = vcmask 1043456   ;;  %v377_v5 = vld [vmem:[%s322_s24] sm:$0xf] }
  0x8f   : > { %922 = vmatprep.subr.bf16.mxu1 %v1222_v0  ;;  %924 = vmatprep.mubr.msk.bf16.mxu1 %vm1223_vm0, %v1222_v0  ;;  %v444_v4 = vsel %vm395_vm1, %v376_v3, 0  ;;  %v504_v6 = vsel %vm503_vm2, %v376_v3, 0  ;;  %vm487_vm3 = vcmask 64512   ;;  %v1036_v23 = vld [vmem:[#allocation6] sm:$0xff]   ;;  %v1037_v24 = vld [vmem:[#allocation6 + $0x8] sm:$0xff]   ;;  %v1038_v30 = vld [vmem:[%s1530_s4] sm:$0xff]  }
  0x90   : > { %915 = vmatpush3.bf16.msra.mxu0 %v1034_v1  ;;  %923 = vmatpush3.bf16.xpose.msra.mxu1 %v444_v4  ;;  %v1039_v35 = vld [vmem:[%s1530_s4 + $0x8] sm:$0xff]   ;;  %v1040_v36 = vld [vmem:[#allocation7] sm:$0xff]   ;;  %v1224_v44 = vmov 0   ;;  %p368_p10 = scmp.lt.s32.totalorder %s1284_s28, 1  ;;  %v724_v54 = vand.u32 127, %v723_v53  ;;  %vm751_vm5 = vcmask 0  }
  0x91   : > { %916 = vmatprep.subr.bf16.mxu0 %v1222_v0  ;;  %934 = vmatprep.subr.bf16.mxu1 %v1222_v0  ;;  %v1041_v37 = vld [vmem:[#allocation7 + $0x8] sm:$0xff]  }
  0x92   : > { %1032 = vset.pattern.permute.xlu1 %v1224_v44  ;;  %1033 = vset.pattern.permute.xlu0 %v1224_v44  ;;  %s1554_s28 = smov (!%p368_p10, %s1284_s28), 1 }
  0x93   : > { %s880_s27 = sshll.u32 %s1554_s28, 3  ;;  %s374_s23 = scalar_lea.vmem %s1533_s7, %s1554_s28 }
  0x94   : > { %917 = vmatpush3.bf16.msra.mxu0 %v1035_v2  ;;  %s371_s22 = scalar_lea.vmem %s1528_s2, %s880_s27 }
  0x95   : > { %928 = vmatprep.subr.bf16.mxu0 %v1222_v0  ;;  %v378_v49 = vld [vmem:[%s371_s22] sm:$0xff] }
  0x97   : > { %919 = vmatmul.mubr.msk.bf16.vlgmr.msra.gmra.mrb[0].mxu0 %vm395_vm1, %v377_v5 }
  0x98   : > { %929 = vmatpush3.bf16.msra.mxu0 %v504_v6  ;;  %930 = vmatprep.mubr.msk.bf16.mxu0 %vm1223_vm0, %v1222_v0 }
  0x99   : > { %950 = vmatprep.subr.bf16.mxu0 %v1222_v0 }
 0x16a   : > { %v433_v7 = vpop.f32.mrb[0].mxu0 }
 0x16b   : > { %v439_v8 = vpack.c.bf16 %v433_v7, %v433_v7  ;;  %v920_v9 = vpop.f32.mrb[1].mxu0 }
 0x16c   : > { %v436_v10 = vpop.f32.mrb[2].mxu0 }
 0x16d   : > { %v921_v11 = vpop.f32.mrb[3].mxu0  ;;  %925 = vmatmul.mubr.msk.bf16.vlgmr.msra.gmra.mrb[0].mxu1 %vm395_vm1, %v439_v8 }
 0x16e   : > { %938 = vmatprep.mubr.msk.bf16.mxu1 %vm1223_vm0, %v1222_v0  ;;  %935 = vmatpush3.bf16.msra.mxu1 %v1036_v23 }
 0x16f   : > { %936 = vmatprep.subr.bf16.mxu1 %v1222_v0 }
 0x172   : > { %937 = vmatpush3.bf16.msra.mxu1 %v1037_v24 }
 0x173   : > { %942 = vmatprep.subr.bf16.mxu1 %v1222_v0 }
 0x240   : > { %v480_v12 = vpop.f32.mrb[0].mxu1 }
 0x241   : > { %v486_v13 = vmul.f32 0.17677669, %v480_v12  ;;  %v926_v14 = vpop.f32.mrb[1].mxu1 }
 0x242   : > { %v483_v15 = vpop.f32.mrb[2].mxu1 }
 0x243   : > { %v927_v16 = vpop.f32.mrb[3].mxu1  ;;  %v488_v17 = vsel %vm487_vm3, %v486_v13, -inf }
 0x244   : > { %489 = vmax.xlane.f32.xlu0 %v488_v17 }
 0x2d1   : > { %v490_v18 = vpop.xlane.xlu0 %489 }
 0x2d2   : > { %v491_v19 = vsub.f32 %v486_v13, %v490_v18 }
 0x2d4   : > { %v492_v20 = vmul.f32 1.442695, %v491_v19 }
 0x2d6   : > { %1042 = vpow2.f32 %v492_v20 }
 0x2e0   : > { %v1043_v21 = vpop.eup %1042 }
 0x2e1   : > { %v494_v22 = vsel %vm487_vm3, %v1043_v21, 0.0 }
 0x2e2   : > { %495 = vadd.xlane.f32.xlu0 %v494_v22 }
 0x36f   : > { %v496_v25 = vpop.xlane.xlu0 %495 }
 0x370   : > { %1044 = vrcp.f32 %v496_v25 }
 0x37a   : > { %v1045_v26 = vpop.eup %1044 }
 0x37b   : > { %v498_v27 = vmul.f32 %v1045_v26, %v1043_v21 }
 0x37d   : > { %v499_v28 = vpack.c.bf16 %v498_v27, %v498_v27 }
 0x37f   : > { %931 = vmatmul.mubr.msk.bf16.vlgmr.msra.gmra.mrb[4].mxu0 %vm487_vm3, %v499_v28 }
 0x380   : > { %954 = vmatprep.mubr.msk.bf16.mxu0 %vm1223_vm0, %v1222_v0  ;;  %951 = vmatpush3.bf16.msra.mxu0 %v1040_v36 }
 0x381   : > { %952 = vmatprep.subr.bf16.mxu0 %v1222_v0 }
 0x384   : > { %953 = vmatpush3.bf16.msra.mxu0 %v1041_v37 }
 0x452   : > { %v540_v29 = vpop.f32.mrb[4].mxu0 }
 0x453   : > { %v550_v31 = vpack.c.bf16 %v540_v29, %v540_v29  ;;  %v932_v32 = vpop.f32.mrb[5].mxu0 }
 0x454   : > { %v543_v33 = vpop.f32.mrb[6].mxu0 }
 0x455   : > { %v933_v34 = vpop.f32.mrb[7].mxu0  ;;  %939 = vmatmul.mubr.msk.bf16.vlgmr.msra.gmra.mrb[4].mxu1 %vm395_vm1, %v550_v31 }
 0x456   : > { %943 = vmatpush3.bf16.msra.mxu1 %v1038_v30  ;;  %946 = vmatprep.mubr.msk.bf16.mxu1 %vm1223_vm0, %v1222_v0 }
 0x457   : > { %944 = vmatprep.subr.bf16.mxu1 %v1222_v0 }
 0x45a   : > { %945 = vmatpush3.bf16.msra.mxu1 %v1039_v35 }
 0x461   : > { %947 = vmatmul.mubr.msk.bf16.vlgmr.msra.gmra.mrb[4].mxu1 %vm395_vm1, %v439_v8 }
 0x534   : > { %v656_v38 = vpop.f32.mrb[4].mxu1 }
 0x535   : > { %1046 = vtanh.f32 %v656_v38  ;;  %v948_v39 = vpop.f32.mrb[5].mxu1 }
 0x536   : > { %v659_v40 = vpop.f32.mrb[6].mxu1 }
 0x537   : > { %v949_v41 = vpop.f32.mrb[7].mxu1 }
 0x53f   : > { %v1047_v42 = vpop.eup %1046 }
 0x540   : > { %v663_v43 = vpack.c.bf16 %v1047_v42, %v1047_v42 }
 0x542   : > { %955 = vmatmul.mubr.msk.bf16.vlgmr.msra.gmra.mrb[8].mxu0 %vm395_vm1, %v663_v43 }
 0x615   : > { %v717_v45 = vpop.f32.mrb[8].mxu0 }
 0x616   : > { %734 = vmax.xlane.f32.xlu1 %v717_v45  ;;  %v956_v46 = vpop.f32.mrb[9].mxu0 }
 0x617   : > { %v720_v47 = vpop.f32.mrb[10].mxu0 }
 0x618   : > { %v957_v48 = vpop.f32.mrb[11].mxu0 }
 0x627   : > { %726 = vperm.xlu1 %1032, %v378_v49  }
 0x6a3   : > { %v735_v50 = vpop.xlane.xlu1 %734 }
 0x6a4   : > { %v736_v51 = vsub.f32 %v717_v45, %v735_v50 }
 0x6a6   : > { %v737_v52 = vmul.f32 1.442695, %v736_v51 }
 0x6a7   : > { %v727_v55 = vpop.permute.xlu1 %726 }
 0x6a8   : > { %1048 = vpow2.f32 %v737_v52  ;;  %vm728_vm4 = vcmp.eq.s32.totalorder %v724_v54, %v727_v55 }
 0x6a9   : > { %v895_v57 = vsel %vm728_vm4, 1.0, %v1222_v0 }
 0x6aa   : > { %v731_v58 = vmul.f32 %v895_v57, %v717_v45 }
 0x6b2   : > { %v1049_v56 = vpop.eup %1048 }
 0x6b3   : > { %739 = vadd.xlane.f32.xlu0 %v1049_v56 }
 0x6b7   : > { %732 = vadd.xlane.f32.xlu0 %v731_v58 }
 0x740   : > { %v740_v59 = vpop.xlane.xlu0 %739 }
 0x741   : > { %1050 = vlog2.f32 %v740_v59 }
 0x744   : > { %v733_v63 = vpop.xlane.xlu0 %732 }
 0x74b   : > { %v1051_v60 = vpop.eup %1050 }
 0x74c   : > { %v742_v61 = vmul.f32 0.6931472, %v1051_v60 }
 0x74e   : > { %v743_v62 = vadd.f32 %v742_v61, %v735_v50 }
 0x750   : > { %v744_v1 = vsub.f32 %v733_v63, %v743_v62 }
 0x752   : > { %v745_v2 = vrot.slane %v744_v1, 4 }
 0x754   : > { %v746_v3 = vadd.f32 %v745_v2, %v744_v1 }
 0x756   : > { %v747_v4 = vrot.slane %v746_v3, 2 }
 0x758   : > { %v748_v5 = vadd.f32 %v747_v4, %v746_v3 }
 0x75a   : > { %v749_v6 = vrot.slane %v748_v5, 1 }
 0x75c   : > { %v750_v0 = vadd.f32 %v749_v6, %v748_v5 }
 0x75e   : > { %752 = vst.msk [vmem:[%s374_s23] sm:$0x1] %vm751_vm5, %v750_v0 }
 0x75f PF: > { %p21_p12 = scmp.ge.s32.totalorder %s1358_s20, 4   ;;  %s1549_s24 = smov %s1206_s25 }
 0x760   : > { %s1550_s25 = smov %s1210_s26  ;;  %s1551_s26 = smov %s1369_s8 }
 0x761   : > { %s1552_s27 = smov %s1358_s20  ;;  %23 = sbr.rel (!%p21_p12) target bundleno = 8 (0x8), region = 112 }
 0x768   :  { %770 = vsyncpa [#allocation3], 1 }
 0x769   :  { %772 = vsyncpa [#allocation3 + $0x1], 1 }
 0x76a   :  { %773 = vsyncpa [#allocation5], 1 }
 0x76b   :  { %775 = vsyncpa [#allocation5 + $0x1], 1 }
 0x76c   :  { %776 = vsyncpa [#allocation8], 1 }

</bundles_post_ra>
